<compile_context>
chip_gen: v7x
topology: tpu7x:2x2x1
jax: 0.10.0
libtpu: 0.0.40
codegen_flags: <defaults>
</compile_context>

<pallas_src>
import jax
import jax.numpy as jnp
from jax import lax
from jax.experimental import pallas as pl
from jax.experimental.pallas import tpu as pltpu

BN_EPS = 1e-5
LEAKY_SLOPE = 0.1


def layer_kernel(x_ref, wt_ref, gamma_ref, beta_ref, o_ref, acc_ref):
    # x_ref:     [B, tk]    input, K tile
    # wt_ref:    [tk, tn]   weight already in [in_dim, out_dim] layout (plain K contraction)
    # gamma_ref: [1, tn]    BatchNorm1d.weight tile (fp32)
    # beta_ref:  [1, tn]    BatchNorm1d.bias tile (fp32)
    # o_ref:     [B, tn]    output tile
    # acc_ref:   [B, tn]    fp32 accumulator scratch, resident across the K axis
    k = pl.program_id(1)

    @pl.when(k == 0)
    def _():
        acc_ref[...] = jnp.zeros_like(acc_ref)

    # Linear. Bias intentionally omitted: with training-mode BN immediately after,
    # a per-feature bias is absorbed by the batch mean and cancels exactly.
    acc_ref[...] += jnp.dot(x_ref[...], wt_ref[...],
                            preferred_element_type=jnp.float32)

    @pl.when(k == pl.num_programs(1) - 1)
    def _():
        y = acc_ref[...]                                        # [B, tn] fp32
        inv_b = 1.0 / y.shape[0]                                # static Python constant
        mu = jnp.sum(y, axis=0, keepdims=True) * inv_b          # [1, tn]
        d = y - mu
        var = jnp.sum(d * d, axis=0, keepdims=True) * inv_b     # biased var, two-pass form
        scale = gamma_ref[...] * lax.rsqrt(var + BN_EPS)        # EUP rsqrt
        z = d * scale + beta_ref[...]                           # fused BN affine
        # LeakyReLU(0.1): for 0 < slope < 1, max(z, slope*z) == leaky_relu(z).
        o_ref[...] = jnp.maximum(z, LEAKY_SLOPE * z).astype(o_ref.dtype)


def _vmem_capacity_bytes():
    try:
        return int(pltpu.get_tpu_info().vmem_capacity_bytes)
    except Exception:
        return 64 * 1024 * 1024  # v7x per-TC capacity — the smallest current chip


def _select_tiles(B, in_dim, out_dim, in_bytes, out_bytes, budget):
    """Pick (tk, tn) whose double-buffered footprint fits the VMEM budget."""

    def footprint(tk, tn):
        return (2 * B * tk * in_bytes        # x block (double-buffered)
                + 2 * tk * tn * in_bytes     # weight block (double-buffered)
                + 2 * B * tn * out_bytes     # output block (double-buffered)
                + B * tn * 4                 # fp32 accumulator scratch
                + 4 * tn * 4)                # gamma/beta (negligible)

    tn_cands = [c for c in (512, 256, 128) if out_dim % c == 0]
    if tn_cands:
        # Prefer tilings that yield >= 2 feature tiles so the parallel grid axis can
        # actually shard across TensorCores (v7x megacore).
        multi = [c for c in tn_cands if out_dim // c >= 2]
        if multi:
            tn_cands = multi + [c for c in tn_cands if c not in multi]
    else:
        tn_cands = [out_dim]

    tk_cands = [c for c in (1024, 512, 256, 128) if in_dim % c == 0] or [in_dim]

    for tn in tn_cands:
        for tk in tk_cands:
            if footprint(tk, tn) <= budget:
                return tk, tn, footprint(tk, tn)
    tk, tn = tk_cands[-1], tn_cands[-1]
    return tk, tn, footprint(tk, tn)


def layer_forward(x, weight, bias, gamma, beta):
    """Pallas implementation of Layer(in_dim, out_dim, bn=True).forward (training mode).

    Args:
      x:      [B, in_dim]
      weight: [out_dim, in_dim]  (PyTorch nn.Linear.weight layout)
      bias:   [out_dim]          (accepted for API parity; cancelled by training-mode BN)
      gamma:  [out_dim]          (BatchNorm1d.weight)
      beta:   [out_dim]          (BatchNorm1d.bias)
    Returns:
      [B, out_dim]
    """
    del bias  # exactly cancelled by training-mode BatchNorm1d; never loaded into VMEM
    # TODO(synk): bn=False / eval-mode (running-stats) path is not fused here; it would
    # need the Linear bias re-added and running mean/var inputs instead of batch stats.

    B, in_dim = x.shape
    out_dim = weight.shape[0]

    in_bytes = jnp.dtype(x.dtype).itemsize
    out_bytes = in_bytes

    vmem_physical = _vmem_capacity_bytes()
    budget = (vmem_physical * 3) // 4  # leave headroom for Mosaic's internal scratch
    tk, tn, foot = _select_tiles(B, in_dim, out_dim, in_bytes, out_bytes, budget)
    grid = (out_dim // tn, in_dim // tk)

    # One-time HBM-level relayout so the kernel's contraction is a plain [B,K]x[K,N]
    # matmul (no per-tile transpose competing with MXU pushes).
    wt = jnp.asarray(weight.T, x.dtype)                 # [in_dim, out_dim]
    g2 = gamma.reshape(1, out_dim).astype(jnp.float32)
    be2 = beta.reshape(1, out_dim).astype(jnp.float32)

    vmem_limit = int(min(vmem_physical, max(foot + foot // 4 + (1 << 20), 16 << 20)))

    return pl.pallas_call(
        layer_kernel,
        out_shape=jax.ShapeDtypeStruct((B, out_dim), x.dtype),
        grid_spec=pltpu.PrefetchScalarGridSpec(
            num_scalar_prefetch=0,
            grid=grid,                                            # (features, K) — K last
            in_specs=[
                pl.BlockSpec((B, tk), lambda j, k: (0, k)),       # x: K tile
                pl.BlockSpec((tk, tn), lambda j, k: (k, j)),      # weight [K, N] tile
                pl.BlockSpec((1, tn), lambda j, k: (0, j)),       # gamma
                pl.BlockSpec((1, tn), lambda j, k: (0, j)),       # beta
            ],
            out_specs=pl.BlockSpec((B, tn), lambda j, k: (0, j)),
            scratch_shapes=[pltpu.VMEM((B, tn), jnp.float32)],    # fp32 accumulator
        ),
        compiler_params=pltpu.CompilerParams(
            dimension_semantics=("parallel", "arbitrary"),
            vmem_limit_bytes=vmem_limit,
        ),
    )(x, wt, g2, be2)


def reference_forward(x, weight, bias, gamma, beta):
    """Pure-JAX reference matching PyTorch Layer forward (training-mode BN, with bias)."""
    y = x @ weight.T + bias
    mu = jnp.mean(y, axis=0, keepdims=True)
    var = jnp.mean((y - mu) ** 2, axis=0, keepdims=True)
    y_hat = (y - mu) / jnp.sqrt(var + BN_EPS)
    z = gamma * y_hat + beta
    return jnp.where(z >= 0, z, LEAKY_SLOPE * z)


if __name__ == "__main__":
    key = jax.random.PRNGKey(0)
    k_x, k_w, k_b = jax.random.split(key, 3)

    # Small shapes: B multiple of 8 (fp32 sublane), out_dim multiple of 128 (lane-dense).
    B, in_dim, out_dim = 8, 32, 128

    x = jax.random.normal(k_x, (B, in_dim), dtype=jnp.float32)

    # Deterministic synthetic parameters (shapes match nn.Linear / nn.BatchNorm1d).
    bound = 1.0 / jnp.sqrt(jnp.float32(in_dim))
    weight = jax.random.uniform(k_w, (out_dim, in_dim), jnp.float32, -bound, bound)
    bias = jax.random.uniform(k_b, (out_dim,), jnp.float32, -bound, bound)
    gamma = jnp.ones((out_dim,), jnp.float32)   # BatchNorm1d default weight init
    beta = jnp.zeros((out_dim,), jnp.float32)   # BatchNorm1d default bias init

    out = layer_forward(x, weight, bias, gamma, beta)
    out = jax.block_until_ready(out)

    ref = reference_forward(x, weight, bias, gamma, beta)
    assert out.shape == (B, out_dim)
    assert jnp.allclose(out, ref, atol=1e-4, rtol=1e-4), "mismatch vs reference"

    print("KERNEL_OK")
</pallas_src>

<mosaic_0001>
module attributes {stable_mosaic.version = 11 : i64} {
  func.func @layer_kernel(%arg0: i32, %arg1: i32, %arg2: memref<8x32xf32, #tpu.memory_space<vmem>>, %arg3: memref<32x128xf32, #tpu.memory_space<vmem>>, %arg4: memref<1x128xf32, #tpu.memory_space<vmem>>, %arg5: memref<1x128xf32, #tpu.memory_space<vmem>>, %arg6: memref<8x128xf32, #tpu.memory_space<vmem>>, %arg7: memref<8x128xf32, #tpu.memory_space<vmem>>) attributes {dimension_semantics = [#tpu.dimension_semantics<parallel>, #tpu.dimension_semantics<arbitrary>], iteration_bounds = array<i64: 1, 1>, scalar_prefetch = 0 : i64, scratch_operands = 1 : i64, tpu.core_type = #tpu.core_type<tc>, window_params = [{transform_indices = @transform_0, window_bounds = array<i64: 8, 32>}, {transform_indices = @transform_1, window_bounds = array<i64: 32, 128>}, {transform_indices = @transform_2, window_bounds = array<i64: 1, 128>}, {transform_indices = @transform_3, window_bounds = array<i64: 1, 128>}, {transform_indices = @transform_4, window_bounds = array<i64: 8, 128>}]} {
    %c0_i32 = arith.constant 0 : i32
    %0 = arith.cmpi eq, %arg1, %c0_i32 : i32
    %1 = arith.extui %0 : i1 to i32
    %c0_i32_0 = arith.constant 0 : i32
    %2 = arith.cmpi ne, %1, %c0_i32_0 : i32
    scf.if %2 {
      %cst_10 = arith.constant 0.000000e+00 : f32
      %12 = vector.broadcast %cst_10 : f32 to vector<8x128xf32>
      %c0_11 = arith.constant 0 : index
      %c0_12 = arith.constant 0 : index
      %13 = vector.load %arg7[%c0_11, %c0_12] : memref<8x128xf32, #tpu.memory_space<vmem>>, vector<8x128xf32>
      tpu.vector_store %arg7[%c0_11, %c0_12], %12 {strides = array<i32>} : memref<8x128xf32, #tpu.memory_space<vmem>>, vector<8x128xf32>,
    } else {
    }
    %c0 = arith.constant 0 : index
    %c0_1 = arith.constant 0 : index
    %3 = vector.load %arg7[%c0, %c0_1] : memref<8x128xf32, #tpu.memory_space<vmem>>, vector<8x128xf32>
    %c0_2 = arith.constant 0 : index
    %c0_3 = arith.constant 0 : index
    %4 = vector.load %arg2[%c0_2, %c0_3] : memref<8x32xf32, #tpu.memory_space<vmem>>, vector<8x32xf32>
    %c0_4 = arith.constant 0 : index
    %c0_5 = arith.constant 0 : index
    %5 = vector.load %arg3[%c0_4, %c0_5] : memref<32x128xf32, #tpu.memory_space<vmem>>, vector<32x128xf32>
    %cst = arith.constant dense<0.000000e+00> : vector<8x128xf32>
    %6 = tpu.matmul %4, %5, %cst {dimension_numbers = #tpu.dot_dimension_numbers<[1], [0], [0], [1], [0, 0, 1, 1], [], []>} : vector<8x32xf32>, vector<32x128xf32>, vector<8x128xf32> -> vector<8x128xf32>
    %7 = arith.addf %3, %6 : vector<8x128xf32>
    %c0_6 = arith.constant 0 : index
    %c0_7 = arith.constant 0 : index
    %8 = vector.load %arg7[%c0_6, %c0_7] : memref<8x128xf32, #tpu.memory_space<vmem>>, vector<8x128xf32>
    tpu.vector_store %arg7[%c0_6, %c0_7], %7 {strides = array<i32>} : memref<8x128xf32, #tpu.memory_space<vmem>>, vector<8x128xf32>,
    %c0_i32_8 = arith.constant 0 : i32
    %9 = arith.cmpi eq, %arg1, %c0_i32_8 : i32
    %10 = arith.extui %9 : i1 to i32
    %c0_i32_9 = arith.constant 0 : i32
    %11 = arith.cmpi ne, %10, %c0_i32_9 : i32
    scf.if %11 {
      %c0_10 = arith.constant 0 : index
      %c0_11 = arith.constant 0 : index
      %12 = vector.load %arg7[%c0_10, %c0_11] : memref<8x128xf32, #tpu.memory_space<vmem>>, vector<8x128xf32>
      %cst_12 = arith.constant dense<0.000000e+00> : vector<128xf32>
      %13 = vector.multi_reduction <add>, %12, %cst_12 [0] : vector<8x128xf32> to vector<128xf32>
      %14 = vector.shape_cast %13 : vector<128xf32> to vector<1x128xf32>
      %cst_13 = arith.constant 1.250000e-01 : f32
      %15 = vector.broadcast %cst_13 : f32 to vector<1x128xf32>
      %16 = arith.mulf %14, %15 : vector<1x128xf32>
      %17 = vector.broadcast %16 : vector<1x128xf32> to vector<8x128xf32>
      %18 = arith.subf %12, %17 : vector<8x128xf32>
      %19 = arith.mulf %18, %18 : vector<8x128xf32>
      %cst_14 = arith.constant dense<0.000000e+00> : vector<128xf32>
      %20 = vector.multi_reduction <add>, %19, %cst_14 [0] : vector<8x128xf32> to vector<128xf32>
      %21 = vector.shape_cast %20 : vector<128xf32> to vector<1x128xf32>
      %cst_15 = arith.constant 1.250000e-01 : f32
      %22 = vector.broadcast %cst_15 : f32 to vector<1x128xf32>
      %23 = arith.mulf %21, %22 : vector<1x128xf32>
      %c0_16 = arith.constant 0 : index
      %c0_17 = arith.constant 0 : index
      %24 = vector.load %arg4[%c0_16, %c0_17] : memref<1x128xf32, #tpu.memory_space<vmem>>, vector<1x128xf32>
      %cst_18 = arith.constant 9.99999974E-6 : f32
      %25 = vector.broadcast %cst_18 : f32 to vector<1x128xf32>
      %26 = arith.addf %23, %25 : vector<1x128xf32>
      %27 = math.rsqrt %26 : vector<1x128xf32>
      %28 = arith.mulf %24, %27 : vector<1x128xf32>
      %29 = vector.broadcast %28 : vector<1x128xf32> to vector<8x128xf32>
      %30 = arith.mulf %18, %29 : vector<8x128xf32>
      %c0_19 = arith.constant 0 : index
      %c0_20 = arith.constant 0 : index
      %31 = vector.load %arg5[%c0_19, %c0_20] : memref<1x128xf32, #tpu.memory_space<vmem>>, vector<1x128xf32>
      %32 = vector.broadcast %31 : vector<1x128xf32> to vector<8x128xf32>
      %33 = arith.addf %30, %32 : vector<8x128xf32>
      %cst_21 = arith.constant 1.000000e-01 : f32
      %34 = vector.broadcast %cst_21 : f32 to vector<8x128xf32>
      %35 = arith.mulf %34, %33 : vector<8x128xf32>
      %36 = arith.maximumf %33, %35 : vector<8x128xf32>
      %c0_22 = arith.constant 0 : index
      %c0_23 = arith.constant 0 : index
      %37 = vector.load %arg6[%c0_22, %c0_23] : memref<8x128xf32, #tpu.memory_space<vmem>>, vector<8x128xf32>
      tpu.vector_store %arg6[%c0_22, %c0_23], %36 {strides = array<i32>} : memref<8x128xf32, #tpu.memory_space<vmem>>, vector<8x128xf32>,
    } else {
    }
    return
  }
  func.func @transform_0(%arg0: i32, %arg1: i32) -> (i32, i32) {
    %c0_i32 = arith.constant 0 : i32
    %c0_i32_0 = arith.constant 0 : i32
    return %c0_i32, %arg1 : i32, i32
  }
  func.func @transform_1(%arg0: i32, %arg1: i32) -> (i32, i32) {
    %c0_i32 = arith.constant 0 : i32
    return %arg1, %arg0 : i32, i32
  }
  func.func @transform_2(%arg0: i32, %arg1: i32) -> (i32, i32) {
    %c0_i32 = arith.constant 0 : i32
    %c0_i32_0 = arith.constant 0 : i32
    return %c0_i32, %arg0 : i32, i32
  }
  func.func @transform_3(%arg0: i32, %arg1: i32) -> (i32, i32) {
    %c0_i32 = arith.constant 0 : i32
    %c0_i32_0 = arith.constant 0 : i32
    return %c0_i32, %arg0 : i32, i32
  }
  func.func @transform_4(%arg0: i32, %arg1: i32) -> (i32, i32) {
    %c0_i32 = arith.constant 0 : i32
    %c0_i32_0 = arith.constant 0 : i32
    return %c0_i32, %arg0 : i32, i32
  }
}

</mosaic_0001>

<bundles_post_ra>
// kernel: tpu_custom_call.1
= control target key start
LH: loop header
LB: loop body
LE: loop exit
PB: predicated region body
PF: predicated region fallthrough
CT: control target
= control target key end

     0   :  { %9 = vsyncpa [#allocation4], 0  ;;  %s377_s0 = inlined_call_operand.hbm [shape: f32[8,32], index: 0, kind: input, shape index: {}]   ;;  %s378_s1 = inlined_call_operand.hbm [shape: f32[32,128], index: 1, kind: input, shape index: {}]   ;;  %s379_s2 = inlined_call_operand.vmem [shape: f32[1,128], index: 2, kind: input, shape index: {}]   ;;  %s380_s3 = inlined_call_operand.vmem [shape: f32[1,128], index: 3, kind: input, shape index: {}]   ;;  %s381_s4 = inlined_call_operand.hbm [shape: f32[8,128], index: 4, kind: output, shape index: {}]  }
   0x1   :  { %10 = vsyncpa [#allocation7], 0 }
   0x2   :  { %11 = vsyncpa [#allocation5], 0  ;;  %s295_s15 = smov [#allocation3]   ;;  %s296_s17 = smov [#allocation6]  }
   0x3   :  { %s18_s16 = sshll.u32 %s295_s15, 4  ;;  %s27_s18 = sshll.u32 %s296_s17, 4  ;;  %s19_s16 = int_to_ptr.vmem [resolvable:$true] %s18_s16  ;;  %s328_s18 = int_to_ptr.vmem [resolvable:$true] %s27_s18 }
   0x4   :  { %s223_s21 = scalar_lea.hbm %s377_s0, 128 }
   0x5   :  { %p224_p0 = scmp.ne.s32.totalorder %s377_s0, %s223_s21  ;;  %p227_p1 = scmp.lt.u32.totalorder %s223_s21, %s377_s0 }
   0x7   :  { %p229_p2 = pnand %p227_p1, %p224_p0 }
   0x9   :  { %232 = shalt.err (!%p229_p2)
}
   0xa   :  { %s233_s26 = scalar_lea.vmem %s19_s16, 128  ;;  %p238_p4 = scmp.lt.s32.totalorder %s19_s16, %s19_s16 }
   0xb   :  { %p234_p3 = scmp.ne.s32.totalorder %s19_s16, %s233_s26  ;;  %p239_p5 = scmp.lt.s32.totalorder %s233_s26, %s233_s26 }
   0xd   :  { %p240_p6 = por %p239_p5, %p238_p4 }
   0xf   :  { %p241_p7 = pnand %p240_p6, %p234_p3 }
  0x11   :  { %244 = shalt.err (!%p241_p7)
}
  0x12   :  { %21 = dma.hbm_to_vmem [thread:$0]  %s377_s0, 128, %s19_s16, [#allocation4]  }
  0x13   :  { %s245_s5 = scalar_lea.hbm %s378_s1, 512 }
  0x14   :  { %p246_p8 = scmp.ne.s32.totalorder %s378_s1, %s245_s5  ;;  %p249_p9 = scmp.lt.u32.totalorder %s245_s5, %s378_s1 }
  0x16   :  { %p251_p10 = pnand %p249_p9, %p246_p8 }
  0x18   :  { %254 = shalt.err (!%p251_p10)
}
  0x19   :  { %s255_s10 = scalar_lea.vmem %s328_s18, 512  ;;  %p260_p12 = scmp.lt.s32.totalorder %s328_s18, %s328_s18 }
  0x1a   :  { %p256_p11 = scmp.ne.s32.totalorder %s328_s18, %s255_s10  ;;  %p261_p13 = scmp.lt.s32.totalorder %s255_s10, %s255_s10 }
  0x1c   :  { %p262_p0 = por %p261_p13, %p260_p12 }
  0x1e   :  { %p263_p1 = pnand %p262_p0, %p256_p11 }
  0x20   :  { %266 = shalt.err (!%p263_p1)
}
  0x21   :  { %s297_s0 = smov 128   ;;  %s298_s11 = smov 8  }
  0x22   :  { %33 = dma.hbm_to_vmem [thread:$0]  %s378_s1, 512, %s328_s18, [#allocation7], %s297_s0, %s297_s0, %s298_s11  }
  0x23   :  { %289 = dma.done.wait [#allocation4], 128  }
  0x24   :  { %290 = vsyncadd [#allocation4], 4294967168 }
  0x25   :  { %291 = dma.done.wait [#allocation7], 512  }
  0x26   :  { %292 = vsyncadd [#allocation7], 4294966784  ;;  %v299_v0 = vmov 0.0|0.0   ;;  %vm300_vm0 = vmmov 0   ;;  %v301_v1 = vmov 0.0   ;;  %v51_v2 = vld [vmem:[#allocation6] sm:$0xff]  ;;  %v156_v28 = vlaneseq }
  0x27   :  { %207 = vmatprep.subr.bf16.mxu0 %v299_v0  ;;  %204 = vmatprep.mubr.msk.f32.mxu0 %vm300_vm0, %v301_v1  ;;  %v52_v3 = vld [vmem:[#allocation6 + $0x8] sm:$0xff]  ;;  %v53_v4 = vld [vmem:[#allocation6 + $0x10] sm:$0xff]  ;;  %v54_v6 = vld [vmem:[#allocation6 + $0x18] sm:$0xff]  ;;  %vm55_vm1 = vcmask 261120   ;;  %s302_s17 = smov [#allocation8]  }
  0x28   :  { %v208_v5 = vpack.c.bf16 %v52_v3, %v51_v2  ;;  %v211_v7 = vpack.c.bf16 %v54_v6, %v53_v4  ;;  %v50_v8 = vld [vmem:[#allocation3] sm:$0xff]  ;;  %v157_v29 = vshrl.u32 %v156_v28, 7  ;;  %s179_s18 = sshll.u32 %s302_s17, 4  ;;  %s180_s18 = int_to_ptr.vmem [resolvable:$true] %s179_s18 }
  0x29   :  { %v151_v30 = vld [vmem:[%s379_s2] sm:$0x1]  ;;  %s267_s19 = scalar_lea.vmem %s180_s18, 128  ;;  %p272_p3 = scmp.lt.s32.totalorder %s180_s18, %s180_s18 }
  0x2a   :  { %209 = vmatpush3.bf16.msra.mxu0 %v208_v5  ;;  %v158_v31 = vsub.s32 0, %v157_v29  ;;  %v190_v35 = vld [vmem:[%s380_s3] ss:$0 sm:$0xff]  ;;  %p268_p2 = scmp.ne.s32.totalorder %s180_s18, %s267_s19  ;;  %p273_p4 = scmp.lt.s32.totalorder %s267_s19, %s267_s19 }
  0x2b   :  { %210 = vmatprep.subr.bf16.mxu0 %v299_v0 }
  0x2c   :  { %p274_p5 = por %p273_p4, %p272_p3 }
  0x2e   :  { %212 = vmatpush3.bf16.msra.mxu0 %v211_v7  ;;  %p275_p6 = pnand %p274_p5, %p268_p2 }
  0x31   :  { %205 = vmatmul.mubr.msk.f32.vlgmr.msra.gmra.mrb[0].mxu0 %vm55_vm1, %v50_v8 }
 0x104   :  { %v125_v9 = vpop.f32.mrb[0].mxu0 }
 0x105   :  { %v135_v10 = vrot.slane %v125_v9, 4  ;;  %v206_v11 = vpop.f32.mrb[1].mxu0 }
 0x107   :  { %v136_v12 = vadd.f32 %v135_v10, %v125_v9 }
 0x109   :  { %v137_v13 = vrot.slane %v136_v12, 2 }
 0x10b   :  { %v138_v14 = vadd.f32 %v137_v13, %v136_v12 }
 0x10d   :  { %v139_v15 = vrot.slane %v138_v14, 1 }
 0x10f   :  { %v140_v16 = vadd.f32 %v139_v15, %v138_v14 }
 0x111   :  { %v141_v17 = vmul.f32 0.125, %v140_v16 }
 0x113   :  { %v142_v18 = vsub.f32 %v125_v9, %v141_v17 }
 0x115   :  { %v143_v19 = vmul.f32 %v142_v18, %v142_v18 }
 0x117   :  { %v144_v20 = vrot.slane %v143_v19, 4 }
 0x119   :  { %v145_v21 = vadd.f32 %v144_v20, %v143_v19 }
 0x11b   :  { %v146_v22 = vrot.slane %v145_v21, 2 }
 0x11d   :  { %v147_v23 = vadd.f32 %v146_v22, %v145_v21 }
 0x11f   :  { %v148_v24 = vrot.slane %v147_v23, 1 }
 0x121   :  { %v149_v25 = vadd.f32 %v148_v24, %v147_v23 }
 0x123   :  { %v150_v26 = vmul.f32 0.125, %v149_v25 }
 0x125   :  { %v152_v27 = vadd.f32 1e-05, %v150_v26 }
 0x127   :  { %221 = vrsqrt.f32 %v152_v27 }
 0x131   :  { %v222_v32 = vpop.eup %221 }
 0x132   :  { %v154_v33 = vmul.f32 %v222_v32, %v151_v30 }
 0x134   :  { %v159_v34 = vrot.slane %v154_v33, %v158_v31 }
 0x136   :  { %v161_v36 = vmul.f32 %v159_v34, %v142_v18 }
 0x138   :  { %v169_v37 = vadd.f32 %v190_v35, %v161_v36 }
 0x13a   :  { %v170_v38 = vmul.f32 0.1, %v169_v37 }
 0x13c   :  { %v171_v39 = vmax.f32 %v169_v37, %v170_v38 }
 0x13e   :  { %172 = vst [vmem:[#allocation8] sm:$0xff] %v171_v39 }
 0x13f   :  { %278 = shalt.err (!%p275_p6)
}
 0x140   :  { %s279_s21 = scalar_lea.hbm %s381_s4, 128 }
 0x141   :  { %p280_p7 = scmp.ne.s32.totalorder %s381_s4, %s279_s21  ;;  %p283_p8 = scmp.lt.u32.totalorder %s279_s21, %s381_s4 }
 0x143   :  { %p285_p9 = pnand %p283_p8, %p280_p7 }
 0x145   :  { %288 = shalt.err (!%p285_p9)
}
 0x146   :  { %182 = dma.vmem_to_hbm [thread:$0]  %s180_s18, 128, %s381_s4, [#allocation5]  }
 0x147   :  { %293 = dma.done.wait [#allocation5], 128  }
 0x148   :  { %294 = vsyncadd [#allocation5], 4294967168 }
 0x149   :  { %186 = vsyncpa [#allocation4], 1 }
 0x14a   :  { %187 = vsyncpa [#allocation7], 1 }
 0x14b   :  { %188 = vsyncpa [#allocation5], 1 }

</bundles_post_ra>
